<compile_context>
chip_gen: v5e
topology: v5e:2x2
jax: 0.10.0
libtpu: 0.0.40
codegen_flags: <defaults>
</compile_context>

<pallas_src>
import jax
import jax.numpy as jnp
from jax.experimental import pallas as pl
from jax.experimental.pallas import tpu as pltpu


def _outconv_kernel(x_ref, w_ref, b_ref, o_ref):
    # x_ref: (nb, C_in, thw)   activation tile, lanes = spatial pixels
    # w_ref: (C_in, C_out, 1)  full weight, resident (constant index_map)
    # b_ref: (1, C_out, 1)     bias
    # o_ref: (nb, C_out, thw)
    c_in = x_ref.shape[1]

    # ci = 0: fold the bias into the first multiply-add -> no zeros-init pass
    # and no separate "+ bias" pass over the tile.
    acc = (w_ref[0:1].astype(jnp.float32) * x_ref[:, 0:1, :].astype(jnp.float32)
           + b_ref[...].astype(jnp.float32))

    # Remaining input channels: unrolled VPU MAC.  Each x row is read (and
    # cast) inside the loop so no full (C_in, thw) f32 temporary is built.
    # (Further micro-opt for v7x: stride-0 sublane-broadcast loads of x rows.)
    for ci in range(1, c_in):
        acc = acc + (w_ref[ci:ci + 1].astype(jnp.float32)
                     * x_ref[:, ci:ci + 1, :].astype(jnp.float32))

    o_ref[...] = acc.astype(o_ref.dtype)


def _choose_tiling(N, C_in, C_out, HW, itemsize, *,
                   max_thw, target_step_bytes, min_steps):
    """Pick (nb, thw, grid) for the (N, C, H*W) streaming layout."""
    LANE = 128
    pad8 = lambda c: -(-c // 8) * 8
    rows = pad8(C_in) + pad8(C_out)          # sublane-padded rows moved per step

    # Lane tile over H*W: as big as the per-step byte budget / max_thw allow.
    thw_cap = max(LANE, (target_step_bytes // (rows * itemsize)) // LANE * LANE)
    thw_cap = min(thw_cap, max(LANE, (max_thw // LANE) * LANE))
    thw = HW if HW <= thw_cap else thw_cap   # full extent, or 128-aligned tile
    grid_hw = pl.cdiv(HW, thw)               # ragged tail padded/masked by Pallas

    # Batch block: grow per-step HBM traffic toward the target, but keep at
    # least `min_steps` grid steps when the problem is big enough (v7x: 2 TCs).
    step_bytes = rows * thw * itemsize
    nb_by_bytes = max(1, target_step_bytes // step_bytes)
    if N * grid_hw >= min_steps:
        nb_cap = max(1, (N * grid_hw) // min_steps)
    else:
        nb_cap = N                           # tiny problem: as few steps as possible
    nb = int(max(1, min(N, nb_by_bytes, nb_cap)))
    grid_n = pl.cdiv(N, nb)
    return nb, thw, (grid_n, grid_hw)


def outconv_pallas(x_nchw, weight, bias, *,
                   max_thw=131072, target_step_bytes=8 << 20, min_steps=8):
    """1x1 conv (nn.Conv2d(in_ch, out_ch, 1)) forward, NCHW in / NCHW out.

    x_nchw: (N, C_in, H, W)
    weight: (C_out, C_in, 1, 1)   -- PyTorch layout
    bias:   (C_out,)
    returns (N, C_out, H, W)
    """
    N, C_in, H, W = x_nchw.shape
    C_out = weight.shape[0]
    HW = H * W
    itemsize = jnp.dtype(x_nchw.dtype).itemsize

    # Free view of the activations (contiguous last dims) + tiny param reshapes.
    x3 = x_nchw.reshape(N, C_in, HW)
    w3 = weight.reshape(C_out, C_in).T.reshape(C_in, C_out, 1)   # (C_in, C_out, 1)
    b3 = bias.reshape(1, C_out, 1)

    nb, thw, grid = _choose_tiling(
        N, C_in, C_out, HW, itemsize,
        max_thw=max_thw, target_step_bytes=target_step_bytes, min_steps=min_steps)

    out3 = pl.pallas_call(
        _outconv_kernel,
        out_shape=jax.ShapeDtypeStruct((N, C_out, HW), x_nchw.dtype),
        grid_spec=pltpu.PrefetchScalarGridSpec(
            num_scalar_prefetch=0,
            grid=grid,
            in_specs=[
                # Activation tile streamed over (batch-block, hw-block).
                pl.BlockSpec((nb, C_in, thw), lambda n, j: (n, 0, j)),
                # Weight / bias: full, constant block index -> loaded once.
                pl.BlockSpec((C_in, C_out, 1), lambda n, j: (0, 0, 0)),
                pl.BlockSpec((1, C_out, 1), lambda n, j: (0, 0, 0)),
            ],
            out_specs=pl.BlockSpec((nb, C_out, thw), lambda n, j: (n, 0, j)),
        ),
        compiler_params=pltpu.CompilerParams(
            dimension_semantics=("parallel", "parallel"),
            # Double-buffered in/out blocks at the largest tile are ~16 MiB;
            # 32 MiB leaves headroom and stays well under v7x's 64 MiB VMEM.
            vmem_limit_bytes=32 * 1024 * 1024,
        ),
    )(x3, w3, b3)

    return out3.reshape(N, C_out, H, W)


if __name__ == "__main__":
    key = jax.random.PRNGKey(0)
    kx, kw, kb = jax.random.split(key, 3)

    N, C_in, H, W = 2, 4, 16, 16
    C_out = 3

    x = jax.random.normal(kx, (N, C_in, H, W), dtype=jnp.float32)
    # Deterministic param init (Conv2d default-like uniform scale).
    bound = 1.0 / jnp.sqrt(jnp.array(C_in, jnp.float32))
    weight = jax.random.uniform(kw, (C_out, C_in, 1, 1),
                                minval=-bound, maxval=bound, dtype=jnp.float32)
    bias = jax.random.uniform(kb, (C_out,),
                              minval=-bound, maxval=bound, dtype=jnp.float32)

    y = outconv_pallas(x, weight, bias)
    y = jax.block_until_ready(y)

    # Reference check in plain JAX (same math, no Pallas).
    y_ref = jnp.einsum("nihw,oi->nohw", x, weight.reshape(C_out, C_in)) \
            + bias.reshape(1, C_out, 1, 1)
    assert y.shape == (N, C_out, H, W)
    assert jnp.allclose(y, y_ref, atol=1e-5, rtol=1e-5)

    print("KERNEL_OK")
</pallas_src>

<mosaic_0001>
module attributes {stable_mosaic.version = 11 : i64} {
  func.func @_outconv_kernel(%arg0: i32, %arg1: i32, %arg2: memref<2x4x256xf32, #tpu.memory_space<vmem>>, %arg3: memref<4x3x1xf32, #tpu.memory_space<vmem>>, %arg4: memref<1x3x1xf32, #tpu.memory_space<vmem>>, %arg5: memref<2x3x256xf32, #tpu.memory_space<vmem>>) attributes {dimension_semantics = [#tpu.dimension_semantics<parallel>, #tpu.dimension_semantics<parallel>], iteration_bounds = array<i64: 1, 1>, scalar_prefetch = 0 : i64, scratch_operands = 0 : i64, tpu.core_type = #tpu.core_type<tc>, window_params = [{transform_indices = @transform_0, window_bounds = array<i64: 2, 4, 256>}, {pipeline_mode = #tpu.pipeline_mode<synchronous>, transform_indices = @transform_1, window_bounds = array<i64: 4, 3, 1>}, {pipeline_mode = #tpu.pipeline_mode<synchronous>, transform_indices = @transform_2, window_bounds = array<i64: 1, 3, 1>}, {transform_indices = @transform_3, window_bounds = array<i64: 2, 3, 256>}]} {
    %c0 = arith.constant 0 : index
    %c0_0 = arith.constant 0 : index
    %c0_1 = arith.constant 0 : index
    %0 = vector.load %arg3[%c0, %c0_0, %c0_1] : memref<4x3x1xf32, #tpu.memory_space<vmem>>, vector<1x3x1xf32>
    %c0_2 = arith.constant 0 : index
    %c0_3 = arith.constant 0 : index
    %c0_4 = arith.constant 0 : index
    %1 = vector.load %arg2[%c0_2, %c0_3, %c0_4] : memref<2x4x256xf32, #tpu.memory_space<vmem>>, vector<2x1x256xf32>
    %2 = vector.broadcast %0 : vector<1x3x1xf32> to vector<2x3x256xf32>
    %3 = vector.broadcast %1 : vector<2x1x256xf32> to vector<2x3x256xf32>
    %4 = arith.mulf %2, %3 : vector<2x3x256xf32>
    %c0_5 = arith.constant 0 : index
    %c0_6 = arith.constant 0 : index
    %c0_7 = arith.constant 0 : index
    %5 = vector.load %arg4[%c0_5, %c0_6, %c0_7] : memref<1x3x1xf32, #tpu.memory_space<vmem>>, vector<1x3x1xf32>
    %6 = vector.broadcast %5 : vector<1x3x1xf32> to vector<2x3x256xf32>
    %7 = arith.addf %4, %6 : vector<2x3x256xf32>
    %c1 = arith.constant 1 : index
    %c0_8 = arith.constant 0 : index
    %c0_9 = arith.constant 0 : index
    %8 = vector.load %arg3[%c1, %c0_8, %c0_9] : memref<4x3x1xf32, #tpu.memory_space<vmem>>, vector<1x3x1xf32>
    %c0_10 = arith.constant 0 : index
    %c1_11 = arith.constant 1 : index
    %c0_12 = arith.constant 0 : index
    %9 = vector.load %arg2[%c0_10, %c1_11, %c0_12] : memref<2x4x256xf32, #tpu.memory_space<vmem>>, vector<2x1x256xf32>
    %10 = vector.broadcast %8 : vector<1x3x1xf32> to vector<2x3x256xf32>
    %11 = vector.broadcast %9 : vector<2x1x256xf32> to vector<2x3x256xf32>
    %12 = arith.mulf %10, %11 : vector<2x3x256xf32>
    %13 = arith.addf %7, %12 : vector<2x3x256xf32>
    %c2 = arith.constant 2 : index
    %c0_13 = arith.constant 0 : index
    %c0_14 = arith.constant 0 : index
    %14 = vector.load %arg3[%c2, %c0_13, %c0_14] : memref<4x3x1xf32, #tpu.memory_space<vmem>>, vector<1x3x1xf32>
    %c0_15 = arith.constant 0 : index
    %c2_16 = arith.constant 2 : index
    %c0_17 = arith.constant 0 : index
    %15 = vector.load %arg2[%c0_15, %c2_16, %c0_17] : memref<2x4x256xf32, #tpu.memory_space<vmem>>, vector<2x1x256xf32>
    %16 = vector.broadcast %14 : vector<1x3x1xf32> to vector<2x3x256xf32>
    %17 = vector.broadcast %15 : vector<2x1x256xf32> to vector<2x3x256xf32>
    %18 = arith.mulf %16, %17 : vector<2x3x256xf32>
    %19 = arith.addf %13, %18 : vector<2x3x256xf32>
    %c3 = arith.constant 3 : index
    %c0_18 = arith.constant 0 : index
    %c0_19 = arith.constant 0 : index
    %20 = vector.load %arg3[%c3, %c0_18, %c0_19] : memref<4x3x1xf32, #tpu.memory_space<vmem>>, vector<1x3x1xf32>
    %c0_20 = arith.constant 0 : index
    %c3_21 = arith.constant 3 : index
    %c0_22 = arith.constant 0 : index
    %21 = vector.load %arg2[%c0_20, %c3_21, %c0_22] : memref<2x4x256xf32, #tpu.memory_space<vmem>>, vector<2x1x256xf32>
    %22 = vector.broadcast %20 : vector<1x3x1xf32> to vector<2x3x256xf32>
    %23 = vector.broadcast %21 : vector<2x1x256xf32> to vector<2x3x256xf32>
    %24 = arith.mulf %22, %23 : vector<2x3x256xf32>
    %25 = arith.addf %19, %24 : vector<2x3x256xf32>
    %c0_23 = arith.constant 0 : index
    %c0_24 = arith.constant 0 : index
    %c0_25 = arith.constant 0 : index
    %26 = vector.load %arg5[%c0_23, %c0_24, %c0_25] : memref<2x3x256xf32, #tpu.memory_space<vmem>>, vector<2x3x256xf32>
    tpu.vector_store %arg5[%c0_23, %c0_24, %c0_25], %25 {strides = array<i32>} : memref<2x3x256xf32, #tpu.memory_space<vmem>>, vector<2x3x256xf32>,
    return
  }
  func.func @transform_0(%arg0: i32, %arg1: i32) -> (i32, i32, i32) {
    %c0_i32 = arith.constant 0 : i32
    %c0_i32_0 = arith.constant 0 : i32
    return %arg0, %c0_i32, %arg1 : i32, i32, i32
  }
  func.func @transform_1(%arg0: i32, %arg1: i32) -> (i32, i32, i32) {
    %c0_i32 = arith.constant 0 : i32
    %c0_i32_0 = arith.constant 0 : i32
    %c0_i32_1 = arith.constant 0 : i32
    %c0_i32_2 = arith.constant 0 : i32
    return %c0_i32, %c0_i32_0, %c0_i32_1 : i32, i32, i32
  }
  func.func @transform_2(%arg0: i32, %arg1: i32) -> (i32, i32, i32) {
    %c0_i32 = arith.constant 0 : i32
    %c0_i32_0 = arith.constant 0 : i32
    %c0_i32_1 = arith.constant 0 : i32
    %c0_i32_2 = arith.constant 0 : i32
    return %c0_i32, %c0_i32_0, %c0_i32_1 : i32, i32, i32
  }
  func.func @transform_3(%arg0: i32, %arg1: i32) -> (i32, i32, i32) {
    %c0_i32 = arith.constant 0 : i32
    %c0_i32_0 = arith.constant 0 : i32
    return %arg0, %c0_i32, %arg1 : i32, i32, i32
  }
}

</mosaic_0001>

<bundles_post_ra>
// kernel: tpu_custom_call.1
= control target key start
LH: loop header
LB: loop body
LE: loop exit
PB: predicated region body
PF: predicated region fallthrough
CT: control target
= control target key end

     0   :  { %v165_v0 = vmov 0   ;;  %vm140_vm0 = vcmask 1043456   ;;  %s231_s1 = inlined_call_operand.vmem [shape: f32[4,3,1], index: 1, kind: input, shape index: {}]   ;;  %s232_s2 = inlined_call_operand.vmem [shape: f32[1,3,1], index: 2, kind: input, shape index: {}]   ;;  %s233_s0 = inlined_call_operand.vmem [shape: f32[2,4,256], index: 0, kind: input, shape index: {}]   ;;  %s234_s3 = inlined_call_operand.vmem [shape: f32[2,3,256], index: 3, kind: output, shape index: {}]  }
   0x1   :  { %163 = vset.pattern.permute.xlu1 %v165_v0  ;;  %162 = vset.pattern.permute.xlu0 %v165_v0  ;;  %v152_v1 = vld [vmem:[%s231_s1 + $0x4] sm:$0x7]  ;;  %v14_v2 = vld [vmem:[%s231_s1] sm:$0x7]  ;;  %v158_v3 = vld [vmem:[%s231_s1 + $0xc] sm:$0x7] }
   0x2   :  { %55 = vperm.xlu1 %163, %v152_v1   ;;  %20 = vperm.xlu0 %162, %v14_v2   ;;  %v155_v4 = vld [vmem:[%s231_s1 + $0x8] sm:$0x7]  ;;  %v37_v5 = vld [vmem:[%s232_s2] sm:$0x7] }
   0x3   :  { %164 = vset.pattern.permute.xlu2 %v165_v0  ;;  %v15_v6 = vld [vmem:[%s233_s0] ss:$4 sm:$0x3]  ;;  %v159_v9 = vld [vmem:[%s233_s0 + $0x3] ss:$4 sm:$0x3] }
   0x4   :  { %113 = vperm.xlu2 %164, %v158_v3   ;;  %v160_v10 = vld [vmem:[%s233_s0 + $0xb] ss:$4 sm:$0x3]  ;;  %v153_v11 = vld [vmem:[%s233_s0 + $0x1] ss:$4 sm:$0x3] }
   0x5   :  { %v151_v12 = vld [vmem:[%s233_s0 + $0x8] ss:$4 sm:$0x3]  ;;  %v154_v13 = vld [vmem:[%s233_s0 + $0x9] ss:$4 sm:$0x3] }
   0x6   :  { %v156_v14 = vld [vmem:[%s233_s0 + $0x2] ss:$4 sm:$0x3]  ;;  %v157_v15 = vld [vmem:[%s233_s0 + $0xa] ss:$4 sm:$0x3] }
   0x7   :  { %v119_v16 = vperm.slane %v159_v9, 1  ;;  %v121_v17 = vperm.slane %v160_v10, 1  ;;  %v25_v18 = vperm.slane %v15_v6, 0  ;;  %v26_v19 = vperm.slane %v15_v6, 1 }
   0x8   :  { %v27_v20 = vperm.slane %v151_v12, 0  ;;  %v28_v21 = vperm.slane %v151_v12, 1  ;;  %v60_v23 = vperm.slane %v153_v11, 0  ;;  %v61_v24 = vperm.slane %v153_v11, 1 }
   0x9   :  { %v62_v25 = vperm.slane %v154_v13, 0  ;;  %v63_v26 = vperm.slane %v154_v13, 1  ;;  %v89_v27 = vperm.slane %v156_v14, 0  ;;  %v90_v28 = vperm.slane %v156_v14, 1 }
   0xa   :  { %84 = vperm.xlu1 %163, %v155_v4   ;;  %40 = vperm.xlu0 %162, %v37_v5   ;;  %v91_v29 = vperm.slane %v157_v15, 0  ;;  %v92_v30 = vperm.slane %v157_v15, 1  ;;  %v118_v31 = vperm.slane %v159_v9, 0  ;;  %v120_v32 = vperm.slane %v160_v10, 0 }
  0x5e   :  { %v114_v22 = vpop.permute.xlu2 %113 }
  0x5f   :  { %v127_v33 = vmul.f32 %v119_v16, %v114_v22  ;;  %v129_v34 = vmul.f32 %v121_v17, %v114_v22  ;;  %v126_v57 = vmul.f32 %v118_v31, %v114_v22  ;;  %v128_v58 = vmul.f32 %v120_v32, %v114_v22 }
  0x74   :  { %v56_v7 = vpop.permute.xlu1 %55  ;;  %v21_v8 = vpop.permute.xlu0 %20 }
  0x75   :  { %v33_v37 = vmul.f32 %v25_v18, %v21_v8  ;;  %v34_v38 = vmul.f32 %v26_v19, %v21_v8  ;;  %v35_v39 = vmul.f32 %v27_v20, %v21_v8  ;;  %v36_v40 = vmul.f32 %v28_v21, %v21_v8 }
  0x76   :  { %v68_v41 = vmul.f32 %v60_v23, %v56_v7  ;;  %v69_v42 = vmul.f32 %v61_v24, %v56_v7  ;;  %v70_v43 = vmul.f32 %v62_v25, %v56_v7  ;;  %v71_v44 = vmul.f32 %v63_v26, %v56_v7 }
  0x7c   :  { %v85_v35 = vpop.permute.xlu1 %84  ;;  %v41_v36 = vpop.permute.xlu0 %40 }
  0x7d   :  { %v43_v45 = vadd.f32 %v41_v36, %v33_v37  ;;  %v44_v46 = vadd.f32 %v41_v36, %v34_v38  ;;  %v45_v47 = vadd.f32 %v41_v36, %v35_v39  ;;  %v46_v48 = vadd.f32 %v41_v36, %v36_v40 }
  0x7e   :  { %v97_v49 = vmul.f32 %v89_v27, %v85_v35  ;;  %v98_v50 = vmul.f32 %v90_v28, %v85_v35  ;;  %v99_v51 = vmul.f32 %v91_v29, %v85_v35  ;;  %v100_v52 = vmul.f32 %v92_v30, %v85_v35 }
  0x7f   :  { %v72_v53 = vadd.f32 %v68_v41, %v43_v45  ;;  %v73_v54 = vadd.f32 %v69_v42, %v44_v46  ;;  %v74_v55 = vadd.f32 %v70_v43, %v45_v47  ;;  %v75_v56 = vadd.f32 %v71_v44, %v46_v48 }
  0x81   :  { %v101_v59 = vadd.f32 %v97_v49, %v72_v53  ;;  %v102_v60 = vadd.f32 %v98_v50, %v73_v54  ;;  %v103_v61 = vadd.f32 %v99_v51, %v74_v55  ;;  %v104_v62 = vadd.f32 %v100_v52, %v75_v56 }
  0x83   :  { %v131_v63 = vadd.f32 %v127_v33, %v102_v60  ;;  %v133_v0 = vadd.f32 %v129_v34, %v104_v62  ;;  %v130_v1 = vadd.f32 %v126_v57, %v101_v59  ;;  %v132_v2 = vadd.f32 %v128_v58, %v103_v61 }
  0x85   :  { %v138_v3 = vrot.slane %v131_v63, 4  ;;  %v139_v4 = vrot.slane %v133_v0, 4 }
  0x87   :  { %v141_v5 = vsel %vm140_vm0, %v130_v1, %v138_v3  ;;  %v142_v6 = vsel %vm140_vm0, %v132_v2, %v139_v4 }
  0x88   :  { %145 = vst [vmem:[%s234_s3] sm:$0x77] %v141_v5 }
  0x89   :  { %146 = vst [vmem:[%s234_s3 + $0x8] sm:$0x77] %v142_v6 }

</bundles_post_ra>
